<compile_context>
chip_gen: v7x
topology: tpu7x:2x2x1
jax: 0.10.0
libtpu: 0.0.40
codegen_flags: <defaults>
</compile_context>

<pallas_src>
import functools

import jax
import jax.numpy as jnp
from jax.experimental import pallas as pl
from jax.experimental.pallas import tpu as pltpu

SUBLANE = 16   # bf16 sublane packing height; batch tiles rounded to this


def _round_up(n, m):
    return ((n + m - 1) // m) * m


def _default_vmem_limit():
    """Generation-aware scoped-VMEM limit (75% of capacity, <=100 MiB)."""
    cap = 64 * 1024 * 1024
    try:
        info = pltpu.get_tpu_info()
        cap = int(getattr(info, "vmem_capacity_bytes", cap))
    except Exception:
        pass
    return min(int(cap * 3 // 4), 100 * 1024 * 1024)


def _fused_mlp_kernel(*refs, num_linear, mxu_dtype):
    """refs = (x_ref, w0, b0, w1, b1, ..., w_{L-1}, b_{L-1}, o_ref).

    Computes relu(x @ w0 + b0) -> ... -> (h @ w_{L-1} + b_{L-1}) entirely in
    VMEM for one batch tile.  Matmul operands are cast to `mxu_dtype`
    (bf16 by default) with an f32 MXU accumulator; bias + ReLU run in f32 on
    the VPU.  Rows are independent, so boundary (tail) blocks are safe.
    """
    x_ref = refs[0]
    o_ref = refs[-1]
    wb_refs = refs[1:-1]

    h = x_ref[...]
    for li in range(num_linear):
        w_ref = wb_refs[2 * li]
        b_ref = wb_refs[2 * li + 1]
        acc = jnp.dot(h.astype(mxu_dtype), w_ref[...],
                      preferred_element_type=jnp.float32)
        acc = acc + b_ref[...].astype(jnp.float32)   # (1, Dout) broadcast
        if li < num_linear - 1:                      # no ReLU after final linear
            acc = jnp.maximum(acc, 0.0)
        h = acc
    o_ref[...] = h.astype(o_ref.dtype)


def fused_mlp_forward(x, params, *, batch_tile=1024, vmem_limit_bytes=None,
                      mxu_dtype=jnp.bfloat16):
    """Run the whole MLP as one Pallas kernel; returns (B, out_dim).

    params: list of (w, b) with w shaped (fan_in, fan_out) and b shaped
    (1, fan_out).  Weights/biases are held VMEM-resident (constant index_map);
    the activation is tiled over the batch.
    """
    B, Din = x.shape
    num_linear = len(params)
    out_dim = params[-1][0].shape[1]

    if vmem_limit_bytes is None:
        vmem_limit_bytes = _default_vmem_limit()

    # ---- batch tile selection (no padded copies; tail block is masked) ----
    tb = min(batch_tile, B)
    if tb < B:
        tb = _round_up(tb, SUBLANE)
    # Give megacore (v7x, 2 TCs) at least two grid steps for medium batches.
    if B > 256 and pl.cdiv(B, tb) < 2:
        tb = _round_up(pl.cdiv(B, 2), SUBLANE)

    # ---- rough resident-VMEM budget check ----
    weight_bytes = sum(w.size * w.dtype.itemsize + b.size * b.dtype.itemsize
                       for (w, b) in params)
    max_feat = max([Din] + [w.shape[1] for (w, _) in params])

    def _act_bytes(t):
        # double-buffered input tile + output tile + largest intermediate
        return 2 * t * Din * 4 + 2 * t * out_dim * 4 + 2 * t * max_feat * 4

    while tb > SUBLANE and weight_bytes + _act_bytes(tb) > vmem_limit_bytes * 0.8:
        tb = max(SUBLANE, _round_up(tb // 2, SUBLANE))
    # TODO(synk): if weight_bytes alone blows the budget (huge hid_dim on v7x),
    # fall back to streaming weight tiles per layer (pltpu.emit_pipeline).

    grid = (pl.cdiv(B, tb),)

    in_specs = [pl.BlockSpec((tb, Din), lambda i: (i, 0))]  # activation tile
    flat_params = []
    for (w, b) in params:
        # Constant index_map => weights/biases stay VMEM-resident across grid.
        in_specs.append(pl.BlockSpec(w.shape, lambda i: (0, 0)))
        in_specs.append(pl.BlockSpec(b.shape, lambda i: (0, 0)))
        flat_params += [w, b]

    flops = 2 * B * sum(w.shape[0] * w.shape[1] for (w, _) in params)
    bytes_accessed = (x.size * x.dtype.itemsize
                      + weight_bytes
                      + B * out_dim * x.dtype.itemsize)

    return pl.pallas_call(
        functools.partial(_fused_mlp_kernel, num_linear=num_linear,
                          mxu_dtype=mxu_dtype),
        out_shape=jax.ShapeDtypeStruct((B, out_dim), x.dtype),
        grid=grid,
        in_specs=in_specs,
        out_specs=pl.BlockSpec((tb, out_dim), lambda i: (i, 0)),
        compiler_params=pltpu.CompilerParams(
            dimension_semantics=("parallel",),
            vmem_limit_bytes=int(vmem_limit_bytes),
        ),
        cost_estimate=pl.CostEstimate(
            flops=int(flops), transcendentals=0,
            bytes_accessed=int(bytes_accessed)),
    )(x, *flat_params)


class MLPModel:
    """JAX/Pallas port of MLP_Model: Linear -> ReLU -> [Linear -> ReLU]* -> Linear."""

    def __init__(self, in_dim, hid_dim, out_dim, num_layer=2, dropout=0.2,
                 key=None, mxu_dtype=jnp.bfloat16):
        # dropout is declared in the PyTorch module but never applied in forward().
        self.dropout = dropout
        self.in_dim, self.hid_dim, self.out_dim = in_dim, hid_dim, out_dim
        self.mxu_dtype = mxu_dtype
        if key is None:
            key = jax.random.PRNGKey(0)

        def init_linear(k, fan_in, fan_out):
            # Mimic torch.nn.Linear default init: U(-1/sqrt(fan_in), 1/sqrt(fan_in))
            kw, kb = jax.random.split(k)
            bound = 1.0 / jnp.sqrt(jnp.float32(fan_in))
            w = jax.random.uniform(kw, (fan_in, fan_out), jnp.float32, -bound, bound)
            b = jax.random.uniform(kb, (fan_out,), jnp.float32, -bound, bound)
            return w, b

        keys = jax.random.split(key, num_layer)
        layers = [init_linear(keys[0], in_dim, hid_dim)]
        for i in range(num_layer - 2):
            layers.append(init_linear(keys[1 + i], hid_dim, hid_dim))
        layers.append(init_linear(keys[-1], hid_dim, out_dim))
        self.layers_f32 = layers  # f32 master copies (reference / export)

        # Kernel params: bf16 weights (full-rate MXU, half DMA/VMEM), f32 bias
        # kept 2-D (1, fan_out) for clean broadcast.  No shape padding at all.
        self.params = []
        for (w, b) in layers:
            self.params.append((w.astype(mxu_dtype), b.reshape(1, -1)))

    def __call__(self, X, training=True, batch_tile=1024):
        return fused_mlp_forward(X, self.params, batch_tile=batch_tile,
                                 mxu_dtype=self.mxu_dtype)


if __name__ == "__main__":
    key = jax.random.PRNGKey(0)
    k_param, k_x, k_x2 = jax.random.split(key, 3)

    batch, in_dim, hid_dim, out_dim, num_layer = 8, 16, 32, 10, 3

    model = MLPModel(in_dim, hid_dim, out_dim, num_layer=num_layer, key=k_param)

    # Pure-JAX references: one matching the kernel math (bf16 MXU inputs,
    # f32 accumulate) and one in full f32 (loose tolerance).
    def ref_forward(x, bf16_mxu=True):
        h = x
        for li, (w, b) in enumerate(model.layers_f32):
            if bf16_mxu:
                h = jnp.dot(h.astype(jnp.bfloat16), w.astype(jnp.bfloat16),
                            preferred_element_type=jnp.float32) + b
            else:
                h = h @ w + b
            if li < len(model.layers_f32) - 1:
                h = jnp.maximum(h, 0.0)
        return h

    # 1) Small-batch case (single grid step, lane dims << 128).
    x = jax.random.normal(k_x, (batch, in_dim), dtype=jnp.float32)
    out = jax.block_until_ready(model(x))
    assert out.shape == (batch, out_dim)
    assert jnp.allclose(out, ref_forward(x), atol=2e-3, rtol=2e-3)
    assert jnp.allclose(out, ref_forward(x, bf16_mxu=False), atol=1e-1, rtol=1e-1)

    # 2) Larger ragged batch: grid = cdiv(200, 64) = 4 with a masked tail block.
    x2 = jax.random.normal(k_x2, (200, in_dim), dtype=jnp.float32)
    out2 = jax.block_until_ready(model(x2, batch_tile=64))
    assert out2.shape == (200, out_dim)
    assert jnp.allclose(out2, ref_forward(x2), atol=2e-3, rtol=2e-3)

    print("KERNEL_OK")
</pallas_src>

<mosaic_0001>
module attributes {stable_mosaic.version = 11 : i64} {
  func.func @_fused_mlp_kernel(%arg0: i32, %arg1: memref<8x16xf32, #tpu.memory_space<vmem>>, %arg2: memref<16x32xbf16, #tpu.memory_space<vmem>>, %arg3: memref<1x32xf32, #tpu.memory_space<vmem>>, %arg4: memref<32x32xbf16, #tpu.memory_space<vmem>>, %arg5: memref<1x32xf32, #tpu.memory_space<vmem>>, %arg6: memref<32x10xbf16, #tpu.memory_space<vmem>>, %arg7: memref<1x10xf32, #tpu.memory_space<vmem>>, %arg8: memref<8x10xf32, #tpu.memory_space<vmem>>) attributes {dimension_semantics = [#tpu.dimension_semantics<parallel>], iteration_bounds = array<i64: 1>, scalar_prefetch = 0 : i64, scratch_operands = 0 : i64, tpu.core_type = #tpu.core_type<tc>, window_params = [{transform_indices = @transform_0, window_bounds = array<i64: 8, 16>}, {pipeline_mode = #tpu.pipeline_mode<synchronous>, transform_indices = @transform_1, window_bounds = array<i64: 16, 32>}, {pipeline_mode = #tpu.pipeline_mode<synchronous>, transform_indices = @transform_2, window_bounds = array<i64: 1, 32>}, {pipeline_mode = #tpu.pipeline_mode<synchronous>, transform_indices = @transform_3, window_bounds = array<i64: 32, 32>}, {pipeline_mode = #tpu.pipeline_mode<synchronous>, transform_indices = @transform_4, window_bounds = array<i64: 1, 32>}, {pipeline_mode = #tpu.pipeline_mode<synchronous>, transform_indices = @transform_5, window_bounds = array<i64: 32, 10>}, {pipeline_mode = #tpu.pipeline_mode<synchronous>, transform_indices = @transform_6, window_bounds = array<i64: 1, 10>}, {transform_indices = @transform_7, window_bounds = array<i64: 8, 10>}]} {
    %c0 = arith.constant 0 : index
    %c0_0 = arith.constant 0 : index
    %0 = vector.load %arg1[%c0, %c0_0] : memref<8x16xf32, #tpu.memory_space<vmem>>, vector<8x16xf32>
    %1 = arith.truncf %0 : vector<8x16xf32> to vector<8x16xbf16>
    %c0_1 = arith.constant 0 : index
    %c0_2 = arith.constant 0 : index
    %2 = vector.load %arg2[%c0_1, %c0_2] : memref<16x32xbf16, #tpu.memory_space<vmem>>, vector<16x32xbf16>
    %cst = arith.constant dense<0.000000e+00> : vector<8x32xf32>
    %3 = tpu.matmul %1, %2, %cst {dimension_numbers = #tpu.dot_dimension_numbers<[1], [0], [0], [1], [0, 0, 1, 1], [], []>} : vector<8x16xbf16>, vector<16x32xbf16>, vector<8x32xf32> -> vector<8x32xf32>
    %c0_3 = arith.constant 0 : index
    %c0_4 = arith.constant 0 : index
    %4 = vector.load %arg3[%c0_3, %c0_4] : memref<1x32xf32, #tpu.memory_space<vmem>>, vector<1x32xf32>
    %5 = vector.broadcast %4 : vector<1x32xf32> to vector<8x32xf32>
    %6 = arith.addf %3, %5 : vector<8x32xf32>
    %cst_5 = arith.constant 0.000000e+00 : f32
    %7 = vector.broadcast %cst_5 : f32 to vector<8x32xf32>
    %8 = arith.maximumf %6, %7 : vector<8x32xf32>
    %9 = arith.truncf %8 : vector<8x32xf32> to vector<8x32xbf16>
    %c0_6 = arith.constant 0 : index
    %c0_7 = arith.constant 0 : index
    %10 = vector.load %arg4[%c0_6, %c0_7] : memref<32x32xbf16, #tpu.memory_space<vmem>>, vector<32x32xbf16>
    %cst_8 = arith.constant dense<0.000000e+00> : vector<8x32xf32>
    %11 = tpu.matmul %9, %10, %cst_8 {dimension_numbers = #tpu.dot_dimension_numbers<[1], [0], [0], [1], [0, 0, 1, 1], [], []>} : vector<8x32xbf16>, vector<32x32xbf16>, vector<8x32xf32> -> vector<8x32xf32>
    %c0_9 = arith.constant 0 : index
    %c0_10 = arith.constant 0 : index
    %12 = vector.load %arg5[%c0_9, %c0_10] : memref<1x32xf32, #tpu.memory_space<vmem>>, vector<1x32xf32>
    %13 = vector.broadcast %12 : vector<1x32xf32> to vector<8x32xf32>
    %14 = arith.addf %11, %13 : vector<8x32xf32>
    %cst_11 = arith.constant 0.000000e+00 : f32
    %15 = vector.broadcast %cst_11 : f32 to vector<8x32xf32>
    %16 = arith.maximumf %14, %15 : vector<8x32xf32>
    %17 = arith.truncf %16 : vector<8x32xf32> to vector<8x32xbf16>
    %c0_12 = arith.constant 0 : index
    %c0_13 = arith.constant 0 : index
    %18 = vector.load %arg6[%c0_12, %c0_13] : memref<32x10xbf16, #tpu.memory_space<vmem>>, vector<32x10xbf16>
    %cst_14 = arith.constant dense<0.000000e+00> : vector<8x10xf32>
    %19 = tpu.matmul %17, %18, %cst_14 {dimension_numbers = #tpu.dot_dimension_numbers<[1], [0], [0], [1], [0, 0, 1, 1], [], []>} : vector<8x32xbf16>, vector<32x10xbf16>, vector<8x10xf32> -> vector<8x10xf32>
    %c0_15 = arith.constant 0 : index
    %c0_16 = arith.constant 0 : index
    %20 = vector.load %arg7[%c0_15, %c0_16] : memref<1x10xf32, #tpu.memory_space<vmem>>, vector<1x10xf32>
    %21 = vector.broadcast %20 : vector<1x10xf32> to vector<8x10xf32>
    %22 = arith.addf %19, %21 : vector<8x10xf32>
    %c0_17 = arith.constant 0 : index
    %c0_18 = arith.constant 0 : index
    %23 = vector.load %arg8[%c0_17, %c0_18] : memref<8x10xf32, #tpu.memory_space<vmem>>, vector<8x10xf32>
    tpu.vector_store %arg8[%c0_17, %c0_18], %22 {strides = array<i32>} : memref<8x10xf32, #tpu.memory_space<vmem>>, vector<8x10xf32>,
    return
  }
  func.func @transform_0(%arg0: i32) -> (i32, i32) {
    %c0_i32 = arith.constant 0 : i32
    %c0_i32_0 = arith.constant 0 : i32
    return %arg0, %c0_i32 : i32, i32
  }
  func.func @transform_1(%arg0: i32) -> (i32, i32) {
    %c0_i32 = arith.constant 0 : i32
    %c0_i32_0 = arith.constant 0 : i32
    %c0_i32_1 = arith.constant 0 : i32
    return %c0_i32, %c0_i32_0 : i32, i32
  }
  func.func @transform_2(%arg0: i32) -> (i32, i32) {
    %c0_i32 = arith.constant 0 : i32
    %c0_i32_0 = arith.constant 0 : i32
    %c0_i32_1 = arith.constant 0 : i32
    return %c0_i32, %c0_i32_0 : i32, i32
  }
  func.func @transform_3(%arg0: i32) -> (i32, i32) {
    %c0_i32 = arith.constant 0 : i32
    %c0_i32_0 = arith.constant 0 : i32
    %c0_i32_1 = arith.constant 0 : i32
    return %c0_i32, %c0_i32_0 : i32, i32
  }
  func.func @transform_4(%arg0: i32) -> (i32, i32) {
    %c0_i32 = arith.constant 0 : i32
    %c0_i32_0 = arith.constant 0 : i32
    %c0_i32_1 = arith.constant 0 : i32
    return %c0_i32, %c0_i32_0 : i32, i32
  }
  func.func @transform_5(%arg0: i32) -> (i32, i32) {
    %c0_i32 = arith.constant 0 : i32
    %c0_i32_0 = arith.constant 0 : i32
    %c0_i32_1 = arith.constant 0 : i32
    return %c0_i32, %c0_i32_0 : i32, i32
  }
  func.func @transform_6(%arg0: i32) -> (i32, i32) {
    %c0_i32 = arith.constant 0 : i32
    %c0_i32_0 = arith.constant 0 : i32
    %c0_i32_1 = arith.constant 0 : i32
    return %c0_i32, %c0_i32_0 : i32, i32
  }
  func.func @transform_7(%arg0: i32) -> (i32, i32) {
    %c0_i32 = arith.constant 0 : i32
    %c0_i32_0 = arith.constant 0 : i32
    return %arg0, %c0_i32 : i32, i32
  }
}

</mosaic_0001>

<bundles_post_ra>
// kernel: tpu_custom_call.1
= control target key start
LH: loop header
LB: loop body
LE: loop exit
PB: predicated region body
PF: predicated region fallthrough
CT: control target
= control target key end

     0   :  { %12 = vsyncpa [#allocation3], 0  ;;  %s451_s0 = inlined_call_operand.vmem [shape: f32[8,16], index: 0, kind: input, shape index: {}]   ;;  %s452_s1 = inlined_call_operand.hbm [shape: bf16[16,32], index: 1, kind: input, shape index: {}]   ;;  %s453_s2 = inlined_call_operand.vmem [shape: f32[1,32], index: 2, kind: input, shape index: {}]   ;;  %s454_s3 = inlined_call_operand.vmem [shape: bf16[32,32], index: 3, kind: input, shape index: {}]   ;;  %s455_s4 = inlined_call_operand.vmem [shape: f32[1,32], index: 4, kind: input, shape index: {}]   ;;  %s456_s5 = inlined_call_operand.vmem [shape: bf16[32,10], index: 5, kind: input, shape index: {}]   ;;  %s457_s6 = inlined_call_operand.vmem [shape: f32[1,10], index: 6, kind: input, shape index: {}]   ;;  %s458_s7 = inlined_call_operand.hbm [shape: f32[8,10], index: 7, kind: output, shape index: {}]  }
   0x1   :  { %13 = vsyncpa [#allocation4], 0  ;;  %s357_s24 = smov [#allocation2]   ;;  %s309_s28 = scalar_lea.hbm %s452_s1, 128 }
   0x2   :  { %s21_s25 = sshll.u32 %s357_s24, 4  ;;  %p310_p0 = scmp.ne.s32.totalorder %s452_s1, %s309_s28  ;;  %s22_s25 = int_to_ptr.vmem [resolvable:$true] %s21_s25 }
   0x3   :  { %p313_p1 = scmp.lt.u32.totalorder %s309_s28, %s452_s1 }
   0x5   :  { %p315_p2 = pnand %p313_p1, %p310_p0 }
   0x7   :  { %318 = shalt.err (!%p315_p2)
}
   0x8   :  { %s319_s10 = scalar_lea.vmem %s22_s25, 128  ;;  %p324_p4 = scmp.lt.s32.totalorder %s22_s25, %s22_s25 }
   0x9   :  { %p320_p3 = scmp.ne.s32.totalorder %s22_s25, %s319_s10  ;;  %p325_p5 = scmp.lt.s32.totalorder %s319_s10, %s319_s10 }
   0xb   :  { %p326_p6 = por %p325_p5, %p324_p4 }
   0xd   :  { %p327_p7 = pnand %p326_p6, %p320_p3 }
   0xf   :  { %330 = shalt.err (!%p327_p7)
}
  0x10   :  { %s358_s11 = smov 64   ;;  %s359_s12 = smov 4  }
  0x11   :  { %27 = dma.hbm_to_vmem [thread:$0]  %s452_s1, 128, %s22_s25, [#allocation3], %s358_s11, %s358_s11, %s359_s12  }
  0x12   :  { %353 = dma.done.wait [#allocation3], 128  }
  0x13   :  { %354 = vsyncadd [#allocation3], 4294967168  ;;  %v360_v0 = vmov 0.0   ;;  %vm361_vm0 = vmmov 0   ;;  %v304_v1 = vld [vmem:[#allocation2] sm:$0xff]   ;;  %vm59_vm1 = vcmask 130048  }
  0x14   :  { %276 = vmatprep.subr.bf16.mxu0 %v360_v0  ;;  %278 = vmatprep.mubr.msk.bf16.mxu0 %vm361_vm0, %v360_v0  ;;  %v42_v2 = vld [vmem:[%s451_s0] sm:$0xff]  ;;  %v306_v5 = vld [vmem:[%s454_s3 + $0x8] sm:$0xff]   ;;  %vm128_vm2 = vcmask 261120   ;;  %s362_s27 = smov [#allocation5]   ;;  %vm240_vm3 = vcmask 80896  }
  0x15   :  { %282 = vmatprep.subr.bf16.mxu1 %v360_v0  ;;  %286 = vmatprep.mubr.msk.bf16.mxu1 %vm361_vm0, %v360_v0  ;;  %v43_v3 = vpack.c.bf16 %v42_v2, %v42_v2  ;;  %v305_v4 = vld [vmem:[%s454_s3] sm:$0xff]   ;;  %v308_v15 = vld [vmem:[%s456_s5 + $0x8] sm:$0xff]   ;;  %s248_s28 = sshll.u32 %s362_s27, 4  ;;  %s249_s28 = int_to_ptr.vmem [resolvable:$true] %s248_s28 }
  0x16   :  { %277 = vmatpush3.bf16.msra.mxu0 %v304_v1  ;;  %283 = vmatpush3.bf16.msra.mxu1 %v305_v4  ;;  %v307_v6 = vld [vmem:[%s456_s5] sm:$0xff]   ;;  %p336_p9 = scmp.lt.s32.totalorder %s249_s28, %s249_s28 }
  0x17   :  { %290 = vmatprep.subr.bf16.mxu0 %v360_v0  ;;  %284 = vmatprep.subr.bf16.mxu1 %v360_v0  ;;  %v257_v7 = vld [vmem:[%s453_s2] ss:$0 sm:$0xff] }
  0x18   :  { %v260_v16 = vld [vmem:[%s455_s4] ss:$0 sm:$0xff]  ;;  %s331_s4 = scalar_lea.vmem %s249_s28, 128 }
  0x19   :  { %279 = vmatmul.mubr.msk.bf16.vlgmr.msra.gmra.mrb[0].mxu0 %vm59_vm1, %v43_v3  ;;  %v264_v24 = vld [vmem:[%s457_s6] ss:$0 sm:$0xff]  ;;  %p332_p8 = scmp.ne.s32.totalorder %s249_s28, %s331_s4  ;;  %p337_p10 = scmp.lt.s32.totalorder %s331_s4, %s331_s4 }
  0x1a   :  { %294 = vmatprep.mubr.msk.bf16.mxu0 %vm361_vm0, %v360_v0  ;;  %285 = vmatpush3.bf16.msra.mxu1 %v306_v5 }
  0x1b   :  { %291 = vmatpush3.bf16.msra.mxu0 %v307_v6  ;;  %p338_p11 = por %p337_p10, %p336_p9 }
  0x1c   :  { %292 = vmatprep.subr.bf16.mxu0 %v360_v0 }
  0x1d   :  { %p339_p12 = pnand %p338_p11, %p332_p8 }
  0x1f   :  { %293 = vmatpush3.bf16.msra.mxu0 %v308_v15 }
  0xec   :  { %v97_v8 = vpop.f32.mrb[0].mxu0 }
  0xed   :  { %v98_v9 = vadd.f32 %v257_v7, %v97_v8  ;;  %v280_v10 = vpop.f32.mrb[1].mxu0 }
  0xee   :  { %v100_v11 = vpop.f32.mrb[2].mxu0 }
  0xef   :  { %v103_v12 = vmax.f32 %v98_v9, 0.0  ;;  %v281_v13 = vpop.f32.mrb[3].mxu0 }
  0xf1   :  { %v104_v14 = vpack.c.bf16 %v103_v12, %v103_v12 }
  0xf3   :  { %287 = vmatmul.mubr.msk.bf16.vlgmr.msra.gmra.mrb[0].mxu1 %vm128_vm2, %v104_v14 }
 0x1c6   :  { %v166_v17 = vpop.f32.mrb[0].mxu1 }
 0x1c7   :  { %v167_v18 = vadd.f32 %v260_v16, %v166_v17  ;;  %v288_v19 = vpop.f32.mrb[1].mxu1 }
 0x1c8   :  { %v169_v20 = vpop.f32.mrb[2].mxu1 }
 0x1c9   :  { %v172_v21 = vmax.f32 %v167_v18, 0.0  ;;  %v289_v22 = vpop.f32.mrb[3].mxu1 }
 0x1cb   :  { %v173_v23 = vpack.c.bf16 %v172_v21, %v172_v21 }
 0x1cd   :  { %295 = vmatmul.mubr.msk.bf16.vlgmr.msra.gmra.mrb[4].mxu0 %vm128_vm2, %v173_v23 }
 0x2a0   :  { %v234_v25 = vpop.f32.mrb[4].mxu0 }
 0x2a1   :  { %v235_v26 = vadd.f32 %v264_v24, %v234_v25  ;;  %v296_v27 = vpop.f32.mrb[5].mxu0 }
 0x2a2   :  { %v237_v28 = vpop.f32.mrb[6].mxu0 }
 0x2a3   :  { %v297_v29 = vpop.f32.mrb[7].mxu0  ;;  %241 = vst.msk [vmem:[#allocation5] sm:$0xff] %vm240_vm3, %v235_v26 }
 0x2a4   :  { %342 = shalt.err (!%p339_p12)
}
 0x2a5   :  { %s343_s6 = scalar_lea.hbm %s458_s7, 128 }
 0x2a6   :  { %p344_p13 = scmp.ne.s32.totalorder %s458_s7, %s343_s6  ;;  %p347_p0 = scmp.lt.u32.totalorder %s343_s6, %s458_s7 }
 0x2a8   :  { %p349_p1 = pnand %p347_p0, %p344_p13 }
 0x2aa   :  { %352 = shalt.err (!%p349_p1)
}
 0x2ab   :  { %251 = dma.vmem_to_hbm [thread:$0]  %s249_s28, 128, %s458_s7, [#allocation4]  }
 0x2ac   :  { %355 = dma.done.wait [#allocation4], 128  }
 0x2ad   :  { %356 = vsyncadd [#allocation4], 4294967168 }
 0x2ae   :  { %255 = vsyncpa [#allocation3], 1 }
 0x2af   :  { %256 = vsyncpa [#allocation4], 1 }

</bundles_post_ra>
